<compile_context>
chip_gen: v7x
topology: tpu7x:2x2x1
jax: 0.10.0
libtpu: 0.0.40
codegen_flags: <defaults>
</compile_context>

<pallas_src>
import math

import jax
import jax.numpy as jnp
from jax.experimental import pallas as pl
from jax.experimental.pallas import tpu as pltpu


# Single XLU strided rotate for the Toeplitz build (used when T % 128 == 0).
_USE_STRIDED_ROLL = True


# ----------------------------------------------------------------------------
# elementwise helpers (exact GELU, matches torch.nn.GELU())
# ----------------------------------------------------------------------------
def _erf(x):
    # Abramowitz & Stegun 7.1.26 (|err| < 1.5e-7); exp + VPU arithmetic only.
    a1 = jnp.float32(0.254829592)
    a2 = jnp.float32(-0.284496736)
    a3 = jnp.float32(1.421413741)
    a4 = jnp.float32(-1.453152027)
    a5 = jnp.float32(1.061405429)
    p = jnp.float32(0.3275911)
    sgn = jnp.where(x >= 0, jnp.float32(1.0), jnp.float32(-1.0))
    ax = jnp.abs(x)
    # EUP reciprocal frees VALU slots in the GELU finalize.
    t = pl.reciprocal(1.0 + p * ax, approx=True)
    poly = ((((a5 * t + a4) * t + a3) * t + a2) * t + a1) * t
    return sgn * (1.0 - poly * jnp.exp(-ax * ax))


def _gelu_exact(x):
    inv_sqrt2 = jnp.float32(1.0 / math.sqrt(2.0))
    return jnp.float32(0.5) * x * (1.0 + _erf(x * inv_sqrt2))


# ----------------------------------------------------------------------------
# Kernel 1: causal long conv (per-channel Toeplitz tile bank built in-kernel)
#           + per-channel D skip + exact GELU
# ----------------------------------------------------------------------------
def _make_conv_gelu_kernel(T, nl, use_strided_roll):
    def kernel(d_sm, u_ref, kpad_ref, y_ref, slab_ref):
        # d_sm:    (H,) f32 in SMEM (scalar prefetch)
        # u_ref:   (1, nl, B, T) f32   -- whole per-channel input, VMEM resident
        # kpad_ref:(1, 1, T + L) f32   -- zero-prepadded SSM kernel, resident
        # y_ref:   (1, B, T) bf16      -- output tile
        # slab_ref:(nl, T, T) bf16     -- per-channel Toeplitz tile bank (scratch)
        h = pl.program_id(0)
        li = pl.program_id(1)

        # Build the per-channel tile bank once (first output tile of each h).
        # slab[d][s, t] = kpad[(d+1)*T + t - s] = k[d*T + t - s], 0 when < 0.
        @pl.when(li == 0)
        def _build_tile_bank():
            for d in range(nl):
                win = kpad_ref[0, :, d * T:(d + 2) * T]          # (1, 2T) static
                if use_strided_roll:
                    # One strided XLU rotate builds the whole (T, 2T) window:
                    # row s is rotated by s, so x[s, j] = win[(j - s) mod 2T];
                    # columns [T, 2T) never wrap -> exact.
                    x = jnp.broadcast_to(win.astype(jnp.bfloat16), (T, 2 * T))
                    x = pltpu.roll(x, 0, 1, stride=1, stride_axis=0)
                    slab_ref[d] = x[:, T:]
                else:
                    # Fallback: log2(T)-step binary shift network (portable,
                    # handles non-128-aligned / non-power-of-two tiles).
                    x = jnp.broadcast_to(win, (T, 2 * T))
                    row = jax.lax.broadcasted_iota(jnp.int32, (T, 1), 0)
                    shift = 1
                    while shift < T:
                        x = jnp.where((row & shift) != 0,
                                      jnp.roll(x, shift, axis=1), x)
                        shift *= 2
                    slab_ref[d] = x[:, T:].astype(jnp.bfloat16)

        bsz = u_ref.shape[2]

        # Causal reduction over input tiles m = 0..li (in-kernel, no dead grid
        # steps); f32 accumulator carried through the loop (vreg resident).
        def step(m, acc):
            u_m = u_ref[0, m].astype(jnp.bfloat16)               # (B, T)
            rhs = slab_ref[li - m]                               # (T, T) bf16
            return acc + jnp.dot(u_m, rhs, preferred_element_type=jnp.float32)

        acc = jax.lax.fori_loop(0, li + 1, step,
                                jnp.zeros((bsz, T), jnp.float32))

        y = acc + d_sm[h] * u_ref[0, li]                         # f32 D skip
        y_ref[0] = _gelu_exact(y).astype(y_ref.dtype)

    return kernel


def _conv_gelu_pallas(D, u_t, kpad, T):
    H, nl, B, _ = u_t.shape
    L = nl * T
    use_strided = _USE_STRIDED_ROLL and (T % 128 == 0)
    kernel = _make_conv_gelu_kernel(T, nl, use_strided)
    flops = H * B * L * (L + T)              # ~2 * causal MACs
    bytes_accessed = u_t.size * 4 + kpad.size * 4 + H * B * L * 2 + D.size * 4
    return pl.pallas_call(
        kernel,
        out_shape=jax.ShapeDtypeStruct((H, B, L), jnp.bfloat16),
        grid_spec=pltpu.PrefetchScalarGridSpec(
            num_scalar_prefetch=1,           # D (H,) lives in SMEM
            grid=(H, nl),
            in_specs=[
                # whole per-channel u, DMA'd once per channel (index only
                # depends on h)
                pl.BlockSpec((1, nl, B, T), lambda h, l, d_sm: (h, 0, 0, 0)),
                # whole zero-prepadded kernel row, resident per channel
                pl.BlockSpec((1, 1, L + T), lambda h, l, d_sm: (h, 0, 0)),
            ],
            out_specs=pl.BlockSpec((1, B, T), lambda h, l, d_sm: (h, 0, l)),
            scratch_shapes=[pltpu.VMEM((nl, T, T), jnp.bfloat16)],
        ),
        compiler_params=pltpu.CompilerParams(
            # H leading "parallel" axis -> megacore sharding on v7x;
            # output-tile axis "arbitrary" so the li==0 tile-bank build runs
            # before the other tiles of the same channel.
            dimension_semantics=("parallel", "arbitrary"),
            vmem_limit_bytes=64 * 1024 * 1024),
        cost_estimate=pl.CostEstimate(
            flops=flops, transcendentals=2 * H * B * L,
            bytes_accessed=bytes_accessed),
    )(D, u_t, kpad)


# ----------------------------------------------------------------------------
# Kernel 2: 1x1 conv (H -> 2H) + bias + GLU, tiled over L (H contracted whole),
#           consumes y in (H, B, L) layout (no intermediate transpose)
# ----------------------------------------------------------------------------
def _glu_kernel(y_ref, w_ref, b_ref, o_ref):
    hd = w_ref.shape[1]                              # d_model
    bsz = y_ref.shape[1]
    tl = y_ref.shape[2]
    w = w_ref[...]                                   # (2H, H) bf16, no cast
    # Hoist the bias broadcasts out of the unrolled batch loop (JAX does not
    # CSE broadcast_in_dim).
    bias_a = jnp.broadcast_to(b_ref[:hd, :], (hd, tl))
    bias_g = jnp.broadcast_to(b_ref[hd:, :], (hd, tl))
    for b in range(bsz):                             # B is small -> unrolled
        y_b = y_ref[:, b, :]                         # (H, TL) bf16
        # MXU: (2H, H) @ (H, TL); M = 2H, N = L tile (lane dense), f32 acc.
        z = jnp.dot(w, y_b, preferred_element_type=jnp.float32)
        a = z[:hd, :] + bias_a
        g = z[hd:, :] + bias_g
        sig = pl.reciprocal(1.0 + jnp.exp(-g), approx=True)   # EUP sigmoid
        o_ref[b] = (a * sig).astype(o_ref.dtype)


def _glu_pallas(y_hbl, W, bias, TL):
    H, B, L = y_hbl.shape
    H2 = W.shape[0]
    nl = L // TL
    flops = 2 * B * H2 * H * L + 6 * B * H * L
    bytes_accessed = y_hbl.size * 2 + W.size * 2 + H2 * 4 + B * H * L * 4
    # TODO(synk): on v7x (64 MiB VMEM) prefer glu_block=256 and single-buffered
    # W (its block index never changes so it is only DMA'd once anyway).
    return pl.pallas_call(
        _glu_kernel,
        out_shape=jax.ShapeDtypeStruct((B, H, L), jnp.float32),
        grid=(nl,),
        in_specs=[
            pl.BlockSpec((H, B, TL), lambda l: (0, 0, l)),
            pl.BlockSpec((H2, H), lambda l: (0, 0)),
            pl.BlockSpec((H2, 1), lambda l: (0, 0)),
        ],
        out_specs=pl.BlockSpec((B, H, TL), lambda l: (0, 0, l)),
        compiler_params=pltpu.CompilerParams(
            dimension_semantics=("parallel",),
            vmem_limit_bytes=64 * 1024 * 1024),
        cost_estimate=pl.CostEstimate(
            flops=flops, transcendentals=B * H * L,
            bytes_accessed=bytes_accessed),
    )(y_hbl, W, bias)


# ----------------------------------------------------------------------------
# plain-JAX glue: parameters + S4DKernel k(H, L) generation (complex math)
# ----------------------------------------------------------------------------
def _pick_tile(length, target):
    t = min(target, length)
    while t >= 128:
        if length % t == 0:
            return t
        t //= 2
    return length   # small / awkward lengths: one full-length block


def make_s4d_params(key, d_model, length, d_state, dt_min=0.001, dt_max=0.1):
    H, N, L = d_model, d_state, length
    k0, k1, k2, k3, k4, k5 = jax.random.split(key, 6)
    log_dt = (jax.random.uniform(k0, (H,)) *
              (math.log(dt_max) - math.log(dt_min)) + math.log(dt_min))
    C_re = jax.random.normal(k1, (H, N // 2)) * (1.0 / math.sqrt(2.0))
    C_im = jax.random.normal(k2, (H, N // 2)) * (1.0 / math.sqrt(2.0))
    log_A_real = jnp.log(0.5 * jnp.ones((H, N // 2)))
    A_imag = math.pi * jnp.broadcast_to(jnp.arange(N // 2, dtype=jnp.float32),
                                        (H, N // 2))
    D = jax.random.normal(k3, (H,))
    W = jax.random.normal(k4, (2 * H, H)) * (1.0 / math.sqrt(H))  # Conv1d k=1
    bias = jax.random.normal(k5, (2 * H,)) * 0.01
    return dict(log_dt=log_dt, C_re=C_re, C_im=C_im, log_A_real=log_A_real,
                A_imag=A_imag, D=D, W=W, bias=bias, length=L)


def s4d_ssm_kernel(params):
    """S4DKernel.forward -> k (H, L).  Complex math, kept in plain JAX."""
    L = params['length']
    dt = jnp.exp(params['log_dt'])                              # (H,)
    C = params['C_re'] + 1j * params['C_im']                    # (H, N/2)
    A = -jnp.exp(params['log_A_real']) + 1j * params['A_imag']  # (H, N/2)
    dtA = A * dt[:, None]                                       # (H, N/2)
    Ls = jnp.arange(L, dtype=jnp.float32)
    K = dtA[:, :, None] * Ls                                    # (H, N/2, L)
    C = C * (jnp.exp(dtA) - 1.0) / A
    k = 2.0 * jnp.einsum('hn,hnl->hl', C, jnp.exp(K)).real
    return k.astype(jnp.float32)


def s4d_forward(u, params, conv_block=512, glu_block=512):
    """Full S4D.forward (transposed=True, eval mode). u: (B, H, L) -> (B, H, L)."""
    B, H, L = u.shape
    k = s4d_ssm_kernel(params)                                   # (H, L) f32

    T = _pick_tile(L, conv_block)
    # keep the per-channel Toeplitz tile bank (L*T*2 bytes bf16) well inside
    # VMEM on all chips (v7x has only 64 MiB physical).
    while T > 128 and (L % (T // 2) == 0) and (L * T * 2) > (24 << 20):
        T //= 2
    nl = L // T
    TL = _pick_tile(L, glu_block)

    # zero-prepad k by one tile: kpad[i] = 0 for i < T, k[i - T] otherwise.
    kpad = jnp.concatenate(
        [jnp.zeros((H, T), jnp.float32), k], axis=1)[:, None, :]  # (H,1,T+L)
    # (B, H, L) -> (H, nl, B, T): per-channel, per-input-tile layout so the
    # in-kernel reduction loop only needs leading-dim dynamic indexing.
    u_t = (u.astype(jnp.float32)
           .reshape(B, H, nl, T).transpose(1, 2, 0, 3))
    D = params['D'].astype(jnp.float32)                          # (H,) -> SMEM

    y_hbl = _conv_gelu_pallas(D, u_t, kpad, T)                   # (H, B, L) bf16

    W = params['W'].astype(jnp.bfloat16)                         # (2H, H) bf16
    bias = params['bias'].astype(jnp.float32)[:, None]           # (2H, 1)
    out = _glu_pallas(y_hbl, W, bias, TL)                        # (B, H, L) f32
    return out, None


def s4d_forward_reference(u, params):
    """Plain-JAX reference using the FFT path (mirrors the PyTorch code)."""
    L = params['length']
    k = s4d_ssm_kernel(params)
    k_f = jnp.fft.rfft(k, n=2 * L)
    u_f = jnp.fft.rfft(u, n=2 * L)
    y = jnp.fft.irfft(u_f * k_f, n=2 * L)[..., :L]
    y = y + u * params['D'][None, :, None]
    y = 0.5 * y * (1.0 + jax.scipy.special.erf(y / math.sqrt(2.0)))  # exact GELU
    z = jnp.einsum('ch,bhl->bcl', params['W'], y) + params['bias'][None, :, None]
    H = u.shape[1]
    return z[:, :H] * jax.nn.sigmoid(z[:, H:]), None


if __name__ == "__main__":
    B, d_model, length, d_state = 2, 4, 16, 8
    key = jax.random.PRNGKey(0)
    pkey, ukey = jax.random.split(key)
    params = make_s4d_params(pkey, d_model, length, d_state)
    u = jax.random.normal(ukey, (B, d_model, length), dtype=jnp.float32)

    y, _ = s4d_forward(u, params)
    y = jax.block_until_ready(y)

    y_ref, _ = s4d_forward_reference(u, params)
    y_ref = jax.block_until_ready(y_ref)

    assert y.shape == (B, d_model, length)
    err = jnp.max(jnp.abs(y - y_ref))
    # Tolerance reflects bf16 MXU inputs / bf16 intermediate y (f32
    # accumulation) vs the exact f32 FFT reference, plus approximate EUP
    # reciprocals in the GELU erf and GLU sigmoid.
    assert jnp.allclose(y, y_ref, atol=3e-2, rtol=3e-2), f"max abs err {err}"
    print("KERNEL_OK")
</pallas_src>

<mosaic_0001>
module attributes {stable_mosaic.version = 11 : i64} {
  func.func @kernel(%arg0: i32, %arg1: i32, %arg2: memref<4xf32, #tpu.memory_space<smem>>, %arg3: memref<1x1x2x16xf32, #tpu.memory_space<vmem>>, %arg4: memref<1x1x32xf32, #tpu.memory_space<vmem>>, %arg5: memref<1x2x16xbf16, #tpu.memory_space<vmem>>, %arg6: memref<1x16x16xbf16, #tpu.memory_space<vmem>>) attributes {dimension_semantics = [#tpu.dimension_semantics<parallel>, #tpu.dimension_semantics<arbitrary>], iteration_bounds = array<i64: 4, 1>, scalar_prefetch = 1 : i64, scratch_operands = 1 : i64, tpu.core_type = #tpu.core_type<tc>, window_params = [{transform_indices = @transform_0, window_bounds = array<i64: 1, 1, 2, 16>}, {transform_indices = @transform_1, window_bounds = array<i64: 1, 1, 32>}, {transform_indices = @transform_2, window_bounds = array<i64: 1, 2, 16>}]} {
    %c0_i32 = arith.constant 0 : i32
    %0 = arith.cmpi eq, %arg1, %c0_i32 : i32
    %1 = arith.extui %0 : i1 to i32
    %c0_i32_0 = arith.constant 0 : i32
    %2 = arith.cmpi ne, %1, %c0_i32_0 : i32
    scf.if %2 {
      %c0_23 = arith.constant 0 : index
      %c0_24 = arith.constant 0 : index
      %c0_25 = arith.constant 0 : index
      %60 = vector.load %arg4[%c0_23, %c0_24, %c0_25] : memref<1x1x32xf32, #tpu.memory_space<vmem>>, vector<1x1x32xf32>
      %61 = vector.shape_cast %60 : vector<1x1x32xf32> to vector<1x32xf32>
      %62 = vector.shape_cast %61 : vector<1x32xf32> to vector<1x32xf32>
      %63 = vector.broadcast %62 : vector<1x32xf32> to vector<16x32xf32>
      %64 = tpu.iota {dimensions = array<i32: 0>} : vector<16x1xi32>
      %c1_i32_26 = arith.constant 1 : i32
      %65 = vector.broadcast %c1_i32_26 : i32 to vector<16x1xi32>
      %66 = arith.andi %64, %65 : vector<16x1xi32>
      %c0_i32_27 = arith.constant 0 : i32
      %67 = vector.broadcast %c0_i32_27 : i32 to vector<16x1xi32>
      %68 = arith.cmpi ne, %66, %67 : vector<16x1xi32>
      %69 = vector.extract_strided_slice %63 {offsets = [0, 31], sizes = [16, 1], strides = [1, 1]} : vector<16x32xf32> to vector<16x1xf32>
      %70 = vector.extract_strided_slice %63 {offsets = [0, 0], sizes = [16, 31], strides = [1, 1]} : vector<16x32xf32> to vector<16x31xf32>
      %71 = tpu.concatenate %69, %70 in 1 : vector<16x1xf32>, vector<16x31xf32> -> vector<16x32xf32>
      %72 = vector.shape_cast %68 : vector<16x1xi1> to vector<16x1xi1>
      %73 = vector.broadcast %72 : vector<16x1xi1> to vector<16x32xi1>
      %74 = arith.select %73, %71, %63 : vector<16x32xi1>, vector<16x32xf32>
      %c2_i32 = arith.constant 2 : i32
      %75 = vector.broadcast %c2_i32 : i32 to vector<16x1xi32>
      %76 = arith.andi %64, %75 : vector<16x1xi32>
      %c0_i32_28 = arith.constant 0 : i32
      %77 = vector.broadcast %c0_i32_28 : i32 to vector<16x1xi32>
      %78 = arith.cmpi ne, %76, %77 : vector<16x1xi32>
      %79 = vector.extract_strided_slice %74 {offsets = [0, 30], sizes = [16, 2], strides = [1, 1]} : vector<16x32xf32> to vector<16x2xf32>
      %80 = vector.extract_strided_slice %74 {offsets = [0, 0], sizes = [16, 30], strides = [1, 1]} : vector<16x32xf32> to vector<16x30xf32>
      %81 = tpu.concatenate %79, %80 in 1 : vector<16x2xf32>, vector<16x30xf32> -> vector<16x32xf32>
      %82 = vector.shape_cast %78 : vector<16x1xi1> to vector<16x1xi1>
      %83 = vector.broadcast %82 : vector<16x1xi1> to vector<16x32xi1>
      %84 = arith.select %83, %81, %74 : vector<16x32xi1>, vector<16x32xf32>
      %c4_i32 = arith.constant 4 : i32
      %85 = vector.broadcast %c4_i32 : i32 to vector<16x1xi32>
      %86 = arith.andi %64, %85 : vector<16x1xi32>
      %c0_i32_29 = arith.constant 0 : i32
      %87 = vector.broadcast %c0_i32_29 : i32 to vector<16x1xi32>
      %88 = arith.cmpi ne, %86, %87 : vector<16x1xi32>
      %89 = vector.extract_strided_slice %84 {offsets = [0, 28], sizes = [16, 4], strides = [1, 1]} : vector<16x32xf32> to vector<16x4xf32>
      %90 = vector.extract_strided_slice %84 {offsets = [0, 0], sizes = [16, 28], strides = [1, 1]} : vector<16x32xf32> to vector<16x28xf32>
      %91 = tpu.concatenate %89, %90 in 1 : vector<16x4xf32>, vector<16x28xf32> -> vector<16x32xf32>
      %92 = vector.shape_cast %88 : vector<16x1xi1> to vector<16x1xi1>
      %93 = vector.broadcast %92 : vector<16x1xi1> to vector<16x32xi1>
      %94 = arith.select %93, %91, %84 : vector<16x32xi1>, vector<16x32xf32>
      %c8_i32 = arith.constant 8 : i32
      %95 = vector.broadcast %c8_i32 : i32 to vector<16x1xi32>
      %96 = arith.andi %64, %95 : vector<16x1xi32>
      %c0_i32_30 = arith.constant 0 : i32
      %97 = vector.broadcast %c0_i32_30 : i32 to vector<16x1xi32>
      %98 = arith.cmpi ne, %96, %97 : vector<16x1xi32>
      %99 = vector.extract_strided_slice %94 {offsets = [0, 24], sizes = [16, 8], strides = [1, 1]} : vector<16x32xf32> to vector<16x8xf32>
      %100 = vector.extract_strided_slice %94 {offsets = [0, 0], sizes = [16, 24], strides = [1, 1]} : vector<16x32xf32> to vector<16x24xf32>
      %101 = tpu.concatenate %99, %100 in 1 : vector<16x8xf32>, vector<16x24xf32> -> vector<16x32xf32>
      %102 = vector.shape_cast %98 : vector<16x1xi1> to vector<16x1xi1>
      %103 = vector.broadcast %102 : vector<16x1xi1> to vector<16x32xi1>
      %104 = arith.select %103, %101, %94 : vector<16x32xi1>, vector<16x32xf32>
      %105 = vector.extract_strided_slice %104 {offsets = [0, 16], sizes = [16, 16], strides = [1, 1]} : vector<16x32xf32> to vector<16x16xf32>
      %106 = arith.truncf %105 : vector<16x16xf32> to vector<16x16xbf16>
      %c0_31 = arith.constant 0 : index
      %c0_32 = arith.constant 0 : index
      %c0_33 = arith.constant 0 : index
      %107 = vector.load %arg6[%c0_31, %c0_32, %c0_33] : memref<1x16x16xbf16, #tpu.memory_space<vmem>>, vector<1x16x16xbf16>
      %108 = vector.shape_cast %107 : vector<1x16x16xbf16> to vector<16x16xbf16>
      %109 = vector.shape_cast %106 : vector<16x16xbf16> to vector<1x16x16xbf16>
      tpu.vector_store %arg6[%c0_31, %c0_32, %c0_33], %109 {strides = array<i32>} : memref<1x16x16xbf16, #tpu.memory_space<vmem>>, vector<1x16x16xbf16>,
    } else {
    }
    %c1_i32 = arith.constant 1 : i32
    %3 = arith.addi %arg1, %c1_i32 : i32
    %cst = arith.constant 0.000000e+00 : f32
    %4 = vector.broadcast %cst : f32 to vector<2x16xf32>
    %c0_i32_1 = arith.constant 0 : i32
    %5 = arith.subi %3, %c0_i32_1 : i32
    %6 = arith.addi %c0_i32_1, %5 : i32
    %c1_i32_2 = arith.constant 1 : i32
    %7 = scf.for %arg7 = %c0_i32_1 to %6 step %c1_i32_2 iter_args(%arg8 = %4) -> (vector<2x16xf32>)  : i32 {
      %c0_23 = arith.constant 0 : index
      %60 = arith.index_cast %arg7 : i32 to index
      %c0_24 = arith.constant 0 : index
      %c0_25 = arith.constant 0 : index
      %61 = vector.load %arg3[%c0_23, %60, %c0_24, %c0_25] : memref<1x1x2x16xf32, #tpu.memory_space<vmem>>, vector<1x1x2x16xf32>
      %62 = vector.shape_cast %61 : vector<1x1x2x16xf32> to vector<2x16xf32>
      %63 = arith.truncf %62 : vector<2x16xf32> to vector<2x16xbf16>
      %64 = arith.subi %arg1, %arg7 : i32
      %65 = arith.index_cast %64 : i32 to index
      %c0_26 = arith.constant 0 : index
      %c0_27 = arith.constant 0 : index
      %66 = vector.load %arg6[%65, %c0_26, %c0_27] : memref<1x16x16xbf16, #tpu.memory_space<vmem>>, vector<1x16x16xbf16>
      %67 = vector.shape_cast %66 : vector<1x16x16xbf16> to vector<16x16xbf16>
      %cst_28 = arith.constant dense<0.000000e+00> : vector<2x16xf32>
      %68 = tpu.matmul %63, %67, %cst_28 {dimension_numbers = #tpu.dot_dimension_numbers<[1], [0], [0], [1], [0, 0, 1, 1], [], []>} : vector<2x16xbf16>, vector<16x16xbf16>, vector<2x16xf32> -> vector<2x16xf32>
      %69 = arith.addf %arg8, %68 : vector<2x16xf32>
      scf.yield %69 : vector<2x16xf32>
    }
    %8 = arith.index_cast %arg0 : i32 to index
    %9 = memref.load %arg2[%8] : memref<4xf32, #tpu.memory_space<smem>>
    %c0 = arith.constant 0 : index
    %10 = arith.index_cast %arg1 : i32 to index
    %c0_3 = arith.constant 0 : index
    %c0_4 = arith.constant 0 : index
    %11 = vector.load %arg3[%c0, %10, %c0_3, %c0_4] : memref<1x1x2x16xf32, #tpu.memory_space<vmem>>, vector<1x1x2x16xf32>
    %12 = vector.shape_cast %11 : vector<1x1x2x16xf32> to vector<2x16xf32>
    %13 = vector.broadcast %9 : f32 to vector<2x16xf32>
    %14 = arith.mulf %13, %12 : vector<2x16xf32>
    %15 = arith.addf %7, %14 : vector<2x16xf32>
    %cst_5 = arith.constant 5.000000e-01 : f32
    %16 = vector.broadcast %cst_5 : f32 to vector<2x16xf32>
    %17 = arith.mulf %16, %15 : vector<2x16xf32>
    %cst_6 = arith.constant 0.707106769 : f32
    %18 = vector.broadcast %cst_6 : f32 to vector<2x16xf32>
    %19 = arith.mulf %15, %18 : vector<2x16xf32>
    %cst_7 = arith.constant 0.000000e+00 : f32
    %20 = vector.broadcast %cst_7 : f32 to vector<2x16xf32>
    %21 = arith.cmpf oge, %19, %20 : vector<2x16xf32>
    %cst_8 = arith.constant 1.000000e+00 : f32
    %cst_9 = arith.constant -1.000000e+00 : f32
    %22 = vector.broadcast %cst_8 : f32 to vector<2x16xf32>
    %23 = vector.broadcast %cst_9 : f32 to vector<2x16xf32>
    %24 = arith.select %21, %22, %23 : vector<2x16xi1>, vector<2x16xf32>
    %25 = math.absf %19 : vector<2x16xf32>
    %cst_10 = arith.constant 0.327591091 : f32
    %26 = vector.broadcast %cst_10 : f32 to vector<2x16xf32>
    %27 = arith.mulf %26, %25 : vector<2x16xf32>
    %cst_11 = arith.constant 1.000000e+00 : f32
    %28 = vector.broadcast %cst_11 : f32 to vector<2x16xf32>
    %29 = arith.addf %28, %27 : vector<2x16xf32>
    %30 = tpu.reciprocal %29 {approx = true} : vector<2x16xf32> -> vector<2x16xf32>
    %cst_12 = arith.constant 1.06140542 : f32
    %31 = vector.broadcast %cst_12 : f32 to vector<2x16xf32>
    %32 = arith.mulf %31, %30 : vector<2x16xf32>
    %cst_13 = arith.constant -1.45315206 : f32
    %33 = vector.broadcast %cst_13 : f32 to vector<2x16xf32>
    %34 = arith.addf %32, %33 : vector<2x16xf32>
    %35 = arith.mulf %34, %30 : vector<2x16xf32>
    %cst_14 = arith.constant 1.42141378 : f32
    %36 = vector.broadcast %cst_14 : f32 to vector<2x16xf32>
    %37 = arith.addf %35, %36 : vector<2x16xf32>
    %38 = arith.mulf %37, %30 : vector<2x16xf32>
    %cst_15 = arith.constant -0.284496725 : f32
    %39 = vector.broadcast %cst_15 : f32 to vector<2x16xf32>
    %40 = arith.addf %38, %39 : vector<2x16xf32>
    %41 = arith.mulf %40, %30 : vector<2x16xf32>
    %cst_16 = arith.constant 0.254829586 : f32
    %42 = vector.broadcast %cst_16 : f32 to vector<2x16xf32>
    %43 = arith.addf %41, %42 : vector<2x16xf32>
    %44 = arith.mulf %43, %30 : vector<2x16xf32>
    %cst_17 = arith.constant 0.000000e+00 : f32
    %45 = vector.broadcast %cst_17 : f32 to vector<2x16xf32>
    %46 = arith.subf %45, %25 : vector<2x16xf32>
    %47 = arith.mulf %46, %25 : vector<2x16xf32>
    %48 = math.exp %47 : vector<2x16xf32>
    %49 = arith.mulf %44, %48 : vector<2x16xf32>
    %cst_18 = arith.constant 1.000000e+00 : f32
    %50 = vector.broadcast %cst_18 : f32 to vector<2x16xf32>
    %51 = arith.subf %50, %49 : vector<2x16xf32>
    %52 = arith.mulf %24, %51 : vector<2x16xf32>
    %cst_19 = arith.constant 1.000000e+00 : f32
    %53 = vector.broadcast %cst_19 : f32 to vector<2x16xf32>
    %54 = arith.addf %53, %52 : vector<2x16xf32>
    %55 = arith.mulf %17, %54 : vector<2x16xf32>
    %56 = arith.truncf %55 : vector<2x16xf32> to vector<2x16xbf16>
    %c0_20 = arith.constant 0 : index
    %c0_21 = arith.constant 0 : index
    %c0_22 = arith.constant 0 : index
    %57 = vector.load %arg5[%c0_20, %c0_21, %c0_22] : memref<1x2x16xbf16, #tpu.memory_space<vmem>>, vector<1x2x16xbf16>
    %58 = vector.shape_cast %57 : vector<1x2x16xbf16> to vector<2x16xbf16>
    %59 = vector.shape_cast %56 : vector<2x16xbf16> to vector<1x2x16xbf16>
    tpu.vector_store %arg5[%c0_20, %c0_21, %c0_22], %59 {strides = array<i32>} : memref<1x2x16xbf16, #tpu.memory_space<vmem>>, vector<1x2x16xbf16>,
    return
  }
  func.func @transform_0(%arg0: i32, %arg1: i32, %arg2: memref<4xf32, #tpu.memory_space<smem>>) -> (i32, i32, i32, i32) {
    %c0_i32 = arith.constant 0 : i32
    %c0_i32_0 = arith.constant 0 : i32
    %c0_i32_1 = arith.constant 0 : i32
    %c0_i32_2 = arith.constant 0 : i32
    return %arg0, %c0_i32, %c0_i32_0, %c0_i32_1 : i32, i32, i32, i32
  }
  func.func @transform_1(%arg0: i32, %arg1: i32, %arg2: memref<4xf32, #tpu.memory_space<smem>>) -> (i32, i32, i32) {
    %c0_i32 = arith.constant 0 : i32
    %c0_i32_0 = arith.constant 0 : i32
    %c0_i32_1 = arith.constant 0 : i32
    return %arg0, %c0_i32, %c0_i32_0 : i32, i32, i32
  }
  func.func @transform_2(%arg0: i32, %arg1: i32, %arg2: memref<4xf32, #tpu.memory_space<smem>>) -> (i32, i32, i32) {
    %c0_i32 = arith.constant 0 : i32
    %c0_i32_0 = arith.constant 0 : i32
    return %arg0, %c0_i32, %arg1 : i32, i32, i32
  }
}

</mosaic_0001>

<bundles_post_ra>
// kernel: tpu_custom_call.1
= control target key start
LH: loop header
LB: loop body
LE: loop exit
PB: predicated region body
PF: predicated region fallthrough
CT: control target
= control target key end

     0   :  { %s1125_s0 = inlined_call_operand.hbm [shape: f32[4], index: 0, kind: input, shape index: {}]   ;;  %s1126_s1 = inlined_call_operand.hbm [shape: f32[4,1,2,16], index: 1, kind: input, shape index: {}]   ;;  %s1127_s2 = inlined_call_operand.hbm [shape: f32[4,1,32], index: 2, kind: input, shape index: {}]   ;;  %s1128_s3 = inlined_call_operand.hbm [shape: bf16[4,2,16], index: 3, kind: output, shape index: {}]  }
   0x1   :  { %s676_s14 = scalar_lea.hbm %s1125_s0, 16 }
   0x2   :  { %p677_p0 = scmp.ne.s32.totalorder %s1125_s0, %s676_s14  ;;  %p680_p1 = scmp.lt.u32.totalorder %s676_s14, %s1125_s0 }
   0x4   :  { %p682_p2 = pnand %p680_p1, %p677_p0 }
   0x6   :  { %685 = shalt.err (!%p682_p2)  }
   0x7   :  { %s852_s19 = smov [#allocation4]  }
   0x8   :  { %9 = dma.hbm_to_smem %s1125_s0, 16, %s852_s19, [#allocation3] }
   0x9   :  { %806 = dma.done.wait [#allocation3], 16 }
   0xa   :  { %807 = vsyncadd [#allocation3], 4294967280 }
   0xb   :  { %11 = sfence }
   0xc   :  { %12 = vsyncpa [#allocation6], 0 }
   0xd   :  { %14 = vsyncpa [#allocation6 + $0x1], 0 }
   0xe   :  { %15 = vsyncpa [#allocation9], 0 }
   0xf   :  { %17 = vsyncpa [#allocation9 + $0x1], 0 }
  0x10   :  { %18 = vsyncpa [#allocation7], 0 }
  0x11   :  { %20 = vsyncpa [#allocation7 + $0x1], 0  ;;  %s900_s22 = smov 0   ;;  %s902_s23 = smov 0  }
  0x12   :  { %s904_s24 = smov 0   ;;  %s906_s25 = smov 0  }
  0x13   :  { %s908_s26 = smov 0   ;;  %s910_s0 = smov 0  }
  0x14 LB: > { %s552_s27 = sadd.s32 4294967295, %s842_s0   ;;  %s553_s28 = sadd.s32 4294967294, %s842_s0   ;;  %s842_s0 = sphi %s910_s0, %s26_s0   ;;  %s838_s26 = sphi %s908_s26, %s1147_s26   ;;  %s834_s25 = sphi %s906_s25, %s1146_s25   ;;  %s830_s24 = sphi %s904_s24, %s1145_s24   ;;  %s826_s23 = sphi %s902_s23, %s1144_s23   ;;  %s822_s22 = sphi %s900_s22, %s1143_s22  }
  0x15   : > { %s38_s29 = sadd.s32 1, %s838_s26  ;;  %s45_s30 = sadd.s32 1, %s830_s24 }
  0x16   : > { %p40_p3 = scmp.ge.s32.totalorder %s38_s29, 4  ;;  %p52_p4 = scmp.ne.s32.totalorder %s830_s24, %s826_s23 }
  0x17   : > { %p53_p5 = scmp.eq.s32.totalorder %s842_s0, 0  ;;  %p58_p6 = scmp.ne.s32.totalorder %s826_s23, %s822_s22 }
  0x18   : > { %s1149_s29 = smov (%p40_p3, %s38_s29), 0  ;;  %p59_p8 = scmp.eq.s32.totalorder %s552_s27, 0 }
  0x19   : > { %p941_p7 = por %p53_p5, %p52_p4  ;;  %s42_s5 = ssub.s32 %s838_s26, %s1149_s29 }
  0x1a   : > { %p110_p9 = scmp.eq.s32.totalorder %s552_s27, 3  ;;  %p43_p10 = scmp.eq.s32.totalorder %s42_s5, 0 }
  0x1b   : > { %p947_p11 = por %p59_p8, %p58_p6  ;;  %p116_p13 = scmp.eq.s32.totalorder %s553_s28, 3 }
  0x1c   : > { %p951_p12 = por %p110_p9, %p52_p4  ;;  %p593_p1 = scmp.lt.s32.totalorder %s842_s0, 4 }
  0x1d   : > { %s1132_s6 = scalar_select %p947_p11, 1, 0 }
  0x1e   : > { %s1133_s7 = scalar_select %p951_p12, 1, 0 }
  0x1f   : > { %s956_s8 = scalar_select %p43_p10, %s830_s24, %s45_s30  }
  0x20   : > { %p958_p0 = por %p116_p13, %p58_p6  ;;  %s964_s10 = sand.u32 1, %s830_s24  }
  0x21   : > { %s556_s11 = sshll.u32 %s964_s10, 1  ;;  %s557_s12 = sshll.u32 %s838_s26, 5 }
  0x22   : > { %s1134_s9 = scalar_select %p958_p0, 1, 0 }
  0x23   : > { %s971_s15 = scalar_lea.hbm %s1126_s1, %s557_s12  ;;  %s140_s16 = scalar_lea.vmem [#allocation5], %s556_s11 }
  0x24   : > { %s147_s17 = sshll.u32 %s140_s16, 4  ;;  %p977_p2 = pnand %p593_p1, %p941_p7  ;;  %s973_s17 = int_to_ptr.vmem [resolvable:$true] %s147_s17 }
  0x25   : > { %s137_s19 = scalar_lea.sflag [#allocation6], %s964_s10  ;;  %s686_s20 = scalar_lea.hbm %s971_s15, 32 }
  0x26   : > { %p687_p5 = scmp.ne.s32.totalorder %s971_s15, %s686_s20  ;;  %p688_p6 = pneg %p977_p2 }
  0x27   : > { %s691_s28 = scalar_lea.hbm %s1126_s1, 128  ;;  %p692_p7 = scmp.lt.u32.totalorder %s971_s15, %s1126_s1 }
  0x28   : > { %p689_p8 = pnand %p688_p6, %p687_p5  ;;  %p693_p10 = scmp.lt.u32.totalorder %s691_s28, %s686_s20 }
  0x29   : > { %p695_p1 = scmp.lt.u32.totalorder %s686_s20, %s971_s15 }
  0x2a   : > { %p690_p9 = pneg %p689_p8  ;;  %p694_p13 = por %p693_p10, %p692_p7 }
  0x2c   : > { %p696_p3 = por %p695_p1, %p694_p13 }
  0x2e   : > { %p697_p4 = pnand %p696_p3, %p690_p9 }
  0x30   : > { %700 = shalt.err (!%p697_p4)
}
  0x31   : > { %s701_s5 = scalar_lea.vmem %s973_s17, 32  ;;  %s853_s11 = smov [#allocation5]  }
  0x32   : > { %p702_p5 = scmp.ne.s32.totalorder %s973_s17, %s701_s5  ;;  %s706_s12 = sshll.u32 %s853_s11, 4  ;;  %s707_s12 = int_to_ptr.vmem [resolvable:$false] %s706_s12 }
  0x33   : > { %s708_s13 = scalar_lea.vmem %s707_s12, 64  ;;  %p709_p12 = scmp.lt.s32.totalorder %s973_s17, %s707_s12 }
  0x34   : > { %p704_p8 = pnand %p702_p5, %p688_p6  ;;  %p710_p7 = scmp.lt.s32.totalorder %s708_s13, %s701_s5 }
  0x36   : > { %p705_p0 = pneg %p704_p8  ;;  %p711_p10 = por %p710_p7, %p709_p12 }
  0x38   : > { %p712_p13 = pnand %p711_p10, %p705_p0 }
  0x3a   : > { %715 = shalt.err (!%p712_p13)
}
  0x3b   : > { %585 = dma.hbm_to_vmem [thread:$0]  (!%p977_p2), %s971_s15, 32, %s973_s17, %s137_s19  }
  0x3c   : > { %p1136_p3 = scmp.lt.s32.totalorder %s842_s0, 5  ;;  %p1137_p4 = scmp.ge.s32.totalorder %s842_s0, 1 }
  0x3d   : > { %s558_s16 = sshll.u32 %s838_s26, 4  ;;  %s157_s20 = scalar_lea.vmem [#allocation8], %s964_s10 }
  0x3e   : > { %p1013_p9 = pnand %p1137_p4, %p1136_p3  ;;  %s164_s21 = sshll.u32 %s157_s20, 4  ;;  %s165_s21 = int_to_ptr.vmem [resolvable:$true] %s164_s21 }
  0x3f   : > { %s1022_s30 = scalar_lea.hbm %s1127_s2, %s558_s16  ;;  %s155_s15 = scalar_lea.sflag [#allocation9], %s964_s10 }
  0x40   : > { %s1138_s14 = scalar_select %p1013_p9, 1, 0 }
  0x41   : > { %s716_s17 = scalar_lea.hbm %s1022_s30, 16  ;;  %s721_s5 = scalar_lea.hbm %s1127_s2, 64 }
  0x42   : > { %p717_p12 = scmp.ne.s32.totalorder %s1022_s30, %s716_s17  ;;  %p722_p5 = scmp.lt.u32.totalorder %s1022_s30, %s1127_s2 }
  0x43   : > { %p723_p8 = scmp.lt.u32.totalorder %s721_s5, %s716_s17  ;;  %p725_p10 = scmp.lt.u32.totalorder %s716_s17, %s1022_s30 }
  0x44   : > { %p719_p0 = pnand %p717_p12, %p688_p6 }
  0x45   : > { %p724_p7 = por %p723_p8, %p722_p5 }
  0x46   : > { %p720_p1 = pneg %p719_p0 }
  0x47   : > { %p726_p13 = por %p725_p10, %p724_p7 }
  0x49   : > { %p727_p3 = pnand %p726_p13, %p720_p1 }
  0x4b   : > { %730 = shalt.err (!%p727_p3)
}
  0x4c   : > { %s731_s10 = scalar_lea.vmem %s165_s21, 16  ;;  %s854_s13 = smov [#allocation8]  }
  0x4d   : > { %p732_p4 = scmp.ne.s32.totalorder %s165_s21, %s731_s10  ;;  %s736_s16 = sshll.u32 %s854_s13, 4  ;;  %s737_s16 = int_to_ptr.vmem [resolvable:$false] %s736_s16 }
  0x4e   : > { %s738_s20 = scalar_lea.vmem %s737_s16, 32  ;;  %p739_p11 = scmp.lt.s32.totalorder %s165_s21, %s737_s16 }
  0x4f   : > { %p734_p12 = pnand %p732_p4, %p688_p6  ;;  %p740_p9 = scmp.lt.s32.totalorder %s738_s20, %s731_s10 }
  0x51   : > { %p735_p0 = pneg %p734_p12  ;;  %p741_p5 = por %p740_p9, %p739_p11 }
  0x53   : > { %p742_p8 = pnand %p741_p5, %p735_p0 }
  0x55   : > { %745 = shalt.err (!%p742_p8)
}
  0x56   : > { %588 = dma.hbm_to_vmem [thread:$0]  (!%p977_p2), %s1022_s30, 16, %s165_s21, %s155_s15  }
  0x57   : > { %p1139_p1 = scmp.ne.s32.totalorder %s1138_s14, 0 }
  0x58   : > { %s1047_s27 = sand.u32 (!%p1139_p1), 1, %s826_s23   ;;  %p1140_p11 = scmp.ne.s32.totalorder (!%p1139_p1), %s1132_s6, 0 }
  0x59   : > { %173 = sbr.rel (%p1139_p1) target bundleno = 982 (0x3d6), region = 28  ;;  %s560_s28 = sshll.u32 (!%p1139_p1), %s1047_s27, 1 }
  0x5a   : > { %s176_s17 = scalar_lea.sflag (!%p1139_p1), [#allocation6], %s1047_s27  ;;  %s1051_s19 = scalar_lea.vmem (!%p1139_p1), [#allocation5], %s560_s28 }
  0x60   : > { %809 = dma.done.wait (%p1140_p11), %s176_s17, 32  }
  0x61   : > { %811 = vsyncadd (%p1140_p11), %s176_s17, 4294967264  ;;  %s185_s18 = scalar_lea.sflag [#allocation9], %s1047_s27  ;;  %s187_s14 = scalar_lea.vmem [#allocation8], %s1047_s27 }
  0x62   : > { %813 = dma.done.wait (%p1140_p11), %s185_s18, 16  }
  0x63   : > { %815 = vsyncadd (%p1140_p11), %s185_s18, 4294967280  ;;  %v561_v0 = vld [vmem:[%s187_s14] ss:$0 sm:$0xff]  ;;  %s855_s21 = smov 97   ;;  %s856_s30 = smov 1   ;;  %v223_v1 = vlaneseq  ;;  %vm236_vm0 = vcmask 7168  }
  0x64   : > { %230 = vrot.lane.b32.xlu0 %v561_v0, %s855_s21  ;;  %s857_s6 = smov 98   ;;  %s858_s15 = smov 2   ;;  %vm262_vm3 = vcmask 15360   ;;  %vm289_vm6 = vcmask 31744   ;;  %vm316_vm9 = vcmask 64512   ;;  %vm330_vm10 = vcmask 130048  }
  0x65   : > { %v224_v2 = vshrl.u32 %v223_v1, 7  ;;  %s859_s4 = smov 4   ;;  %s860_s5 = smov 100   ;;  %v844_v36 = vmov 0.0  }
  0x66   : > { %s861_s11 = smov 8   ;;  %s862_s12 = smov 104  }
  0x67   : > { %v225_v3 = vadd.s32 8, %v224_v2  ;;  %v226_v5 = vand.u32 1, %v224_v2  ;;  %v244_v13 = vand.u32 2, %v224_v2  ;;  %v271_v26 = vand.u32 4, %v224_v2  ;;  %s863_s10 = smov 112   ;;  %s210_s13 = scalar_lea.vmem [#allocation10], %s1047_s27 }
  0x68   : > { %233 = vrot.lane.b32.xlu0 %v561_v0, %s856_s30  ;;  %s848_s16 = smov 0  }
  0x69   : > { %v227_v4 = vand.u32 1, %v225_v3  ;;  %vm228_vm2 = vcmp.ne.s32.totalorder %v226_v5, 0  ;;  %v245_v11 = vand.u32 2, %v225_v3  ;;  %vm246_vm5 = vcmp.ne.s32.totalorder %v244_v13, 0 }
  0x6a   : > { %v272_v21 = vand.u32 4, %v225_v3  ;;  %vm273_vm8 = vcmp.ne.s32.totalorder %v271_v26, 0 }
  0x6b   : > { %vm229_vm1 = vcmp.ne.s32.totalorder %v227_v4, 0  ;;  %vm247_vm4 = vcmp.ne.s32.totalorder %v245_v11, 0 }
  0x6c   : > { %vm274_vm7 = vcmp.ne.s32.totalorder %v272_v21, 0 }
  0xd6   : > { %v231_v6 = vpop.permute.xlu0 %230 }
  0xda   : > { %v234_v7 = vpop.permute.xlu0 %233 }
  0xdb   : > { %v237_v8 = vsel %vm236_vm0, %v231_v6, %v234_v7 }
  0xdc   : > { %v243_v9 = vsel %vm229_vm1, %v237_v8, %v561_v0  ;;  %v242_v10 = vsel %vm228_vm2, %v237_v8, %v561_v0 }
  0xdd   : > { %252 = vrot.lane.b32.xlu1 %v243_v9, %s857_s6  ;;  %250 = vrot.lane.b32.xlu0 %v242_v10, %s857_s6 }
  0xe1   : > { %258 = vrot.lane.b32.xlu1 %v243_v9, %s858_s15 }
  0xe5   : > { %256 = vrot.lane.b32.xlu1 %v242_v10, %s858_s15 }
 0x14f   : > { %v253_v12 = vpop.permute.xlu1 %252  ;;  %v251_v17 = vpop.permute.xlu0 %250 }
 0x153   : > { %v259_v14 = vpop.permute.xlu1 %258 }
 0x154   : > { %v264_v15 = vsel %vm262_vm3, %v253_v12, %v259_v14 }
 0x155   : > { %v270_v16 = vsel %vm247_vm4, %v264_v15, %v243_v9 }
 0x156   : > { %285 = vrot.lane.b32.xlu1 %v270_v16, %s859_s4  ;;  %279 = vrot.lane.b32.xlu0 %v270_v16, %s860_s5 }
 0x157   : > { %v257_v18 = vpop.permute.xlu1 %256 }
 0x158   : > { %v263_v19 = vsel %vm262_vm3, %v251_v17, %v257_v18 }
 0x159   : > { %v269_v20 = vsel %vm246_vm5, %v263_v19, %v242_v10 }
 0x15a   : > { %283 = vrot.lane.b32.xlu1 %v269_v20, %s859_s4  ;;  %277 = vrot.lane.b32.xlu0 %v269_v20, %s860_s5 }
 0x1c8   : > { %v286_v22 = vpop.permute.xlu1 %285  ;;  %v280_v23 = vpop.permute.xlu0 %279 }
 0x1c9   : > { %v291_v24 = vsel %vm289_vm6, %v280_v23, %v286_v22 }
 0x1ca   : > { %v297_v25 = vsel %vm274_vm7, %v291_v24, %v270_v16 }
 0x1cb   : > { %312 = vrot.lane.b32.xlu1 %v297_v25, %s861_s11  ;;  %306 = vrot.lane.b32.xlu0 %v297_v25, %s862_s12 }
 0x1cc   : > { %v284_v27 = vpop.permute.xlu1 %283  ;;  %v278_v28 = vpop.permute.xlu0 %277 }
 0x1cd   : > { %v290_v29 = vsel %vm289_vm6, %v278_v28, %v284_v27 }
 0x1ce   : > { %v296_v32 = vsel %vm273_vm8, %v290_v29, %v269_v20 }
 0x23d   : > { %v313_v30 = vpop.permute.xlu1 %312  ;;  %v307_v31 = vpop.permute.xlu0 %306 }
 0x23e   : > { %v318_v33 = vsel %vm316_vm9, %v307_v31, %v313_v30 }
 0x23f   : > { %v325_v34 = vpack.c.bf16 %v318_v33, %v296_v32 }
 0x241   : > { %327 = vrot.lane.b32.xlu0 %v325_v34, %s863_s10 }
 0x2b3   : > { %v328_v35 = vpop.permute.xlu0 %327 }
 0x2b4   : > { %331 = vst.msk [vmem:[#allocation2] sm:$0xff] %vm330_vm10, %v328_v35 }
 0x2b5 LB: >> { %v864_v37 = vmov 0.0   ;;  %vm865_vm11 = vmmov 0   ;;  %s562_s20 = sshll.u32 %s850_s16, 1  ;;  %s344_s28 = ssub.s32 0, %s850_s16  ;;  %s850_s16 = sphi %s848_s16, %s336_s16   ;;  %v846_v36 = vphi %v844_v36, %v845_v36  }
 0x2b6   : >> { %570 = vmatprep.subr.bf16.mxu0 %v864_v37  ;;  %572 = vmatprep.mubr.msk.bf16.mxu0 %vm865_vm11, %v864_v37  ;;  %s341_s17 = scalar_lea.vmem %s1051_s19, %s562_s20 [#allocation5]  ;;  %s563_s18 = sshll.u32 %s344_s28, 3 }
 0x2b7   : >> { %v342_v38 = vld [vmem:[%s341_s17] sm:$0x3]  ;;  %s346_s14 = scalar_lea.vmem [#allocation2], %s563_s18  ;;  %s336_s16 = sadd.s32 1, %s850_s16  }
 0x2b8   : >> { %v343_v40 = vpack.c.bf16 %v342_v38, %v342_v38  ;;  %p335_p2 = scmp.ge.s32.totalorder %s336_s16, 1 }
 0x2b9   : > { %s393_s21 = sld [smem:[#allocation4 + %s834_s25]] (%p335_p2)  ;;  %v396_v46 = vld [vmem:[%s1051_s19] sm:$0x3] (%p335_p2)  ;;  %v866_v5 = vmov (%p335_p2), -1.0   ;;  %s565_s19 = sshll.u32 (%p335_p2), %s834_s25, 4  ;;  %vm427_vm13 = vcmask (%p335_p2), 122880  }
 0x2ba   : > { %s443_s30 = sshll.u32 (%p335_p2), %s210_s13, 4  ;;  %s1075_s4 = scalar_lea.hbm (%p335_p2), %s1128_s3, %s565_s19  ;;  %s1077_s30 = int_to_ptr.vmem [resolvable:$true] %s443_s30 }
 0x2bb   : >> { %v347_v39 = vld [vmem:[%s346_s14] sm:$0xff]  ;;  %s430_s5 = scalar_lea.sflag (%p335_p2), [#allocation7], %s1047_s27  ;;  %s746_s11 = scalar_lea.vmem (%p335_p2), %s1077_s30, 16 }
 0x2bc   : >> { %571 = vmatpush3.bf16.msra.mxu0 %v347_v39  ;;  %p747_p6 = scmp.ne.s32.totalorder (%p335_p2), %s1077_s30, %s746_s11  ;;  %p1141_p9 = scmp.ne.s32.totalorder (%p335_p2), %s1133_s7, 0 }
 0x2bd   : > { %s867_s25 = smov (%p335_p2), [#allocation10]  }
 0x2be   : > { %p748_p7 = pnand (%p335_p2), %p747_p6, %p1141_p9  ;;  %s750_s12 = sshll.u32 (%p335_p2), %s867_s25, 4  ;;  %s751_s12 = int_to_ptr.vmem [resolvable:$false] %s750_s12 }
 0x2bf   : >> { %573 = vmatmul.mubr.msk.bf16.vlgmr.msra.gmra.mrb[0].mxu0 %vm330_vm10, %v343_v40  ;;  %v397_v47 = vstv (%p335_p2), %s393_s21  ;;  %s752_s10 = scalar_lea.vmem (%p335_p2), %s751_s12, 32  ;;  %p753_p13 = scmp.lt.s32.totalorder (%p335_p2), %s1077_s30, %s751_s12 }
 0x2c0   : > { %v398_v48 = vmul.f32 (%p335_p2), %v397_v47, %v396_v46  ;;  %p749_p10 = pneg (%p335_p2), %p748_p7  ;;  %p754_p3 = scmp.lt.s32.totalorder (%p335_p2), %s752_s10, %s746_s11 }
 0x2c2   : > { %p755_p4 = por (%p335_p2), %p754_p3, %p753_p13 }
 0x2c4   : > { %p756_p12 = pnand (%p335_p2), %p755_p4, %p749_p10 }
 0x38f   : > { %338 = sbr.rel (!%p335_p2) target bundleno = 693 (0x2b5), region = 100 }
 0x392   : >> { %v386_v41 = vpop.f32.mrb[0].mxu0 }
 0x393   : >> { %v392_v42 = vadd.f32 %v846_v36, %v386_v41   ;;  %v574_v43 = vpop.f32.mrb[1].mxu0 }
 0x394   : >> { %v389_v44 = vpop.f32.mrb[2].mxu0 }
 0x395   : >> { %v575_v45 = vpop.f32.mrb[3].mxu0  ;;  %v845_v36 = vmov %v392_v42   ;;  %v399_v49 = vadd.f32 (%p335_p2), %v398_v48, %v392_v42 }
 0x397   : > { %v401_v50 = vmul.f32 0.70710677, %v399_v49  ;;  %v400_v8 = vmul.f32 0.5, %v399_v49 }
 0x399   : > { %v404_v51 = vand.u32 2147483647, %v401_v50  ;;  %vm402_vm12 = vcmp.ge.f32.partialorder %v401_v50, 0.0 }
 0x39a   : > { %v403_v6 = vsel %vm402_vm12, 1.0, %v866_v5 }
 0x39b   : > { %v405_v52 = vmul.f32 0.3275911, %v404_v51  ;;  %v417_v54 = vsub.f32 0.0, %v404_v51 }
 0x39d   : > { %v406_v53 = vadd.f32 1.0, %v405_v52  ;;  %v418_v55 = vmul.f32 %v417_v54, %v404_v51 }
 0x39f   : > { %672 = vrcp.f32 %v406_v53  ;;  %v419_v58 = vmul.f32 1.442695, %v418_v55 }
 0x3a1   : > { %674 = vpow2.f32 %v419_v58 }
 0x3a9   : > { %v673_v56 = vpop.eup %672 }
 0x3aa   : > { %v408_v57 = vmul.f32 1.0614054, %v673_v56 }
 0x3ab   : > { %v675_v2 = vpop.eup %674 }
 0x3ac   : > { %v409_v59 = vadd.f32 -1.4531521, %v408_v57 }
 0x3ae   : > { %v410_v60 = vmul.f32 %v673_v56, %v409_v59 }
 0x3b0   : > { %v411_v61 = vadd.f32 1.4214138, %v410_v60 }
 0x3b2   : > { %v412_v62 = vmul.f32 %v673_v56, %v411_v61 }
 0x3b4   : > { %v413_v63 = vadd.f32 -0.28449672, %v412_v62 }
 0x3b6   : > { %v414_v0 = vmul.f32 %v673_v56, %v413_v63 }
 0x3b8   : > { %v415_v1 = vadd.f32 0.2548296, %v414_v0 }
 0x3ba   : > { %v416_v3 = vmul.f32 %v673_v56, %v415_v1 }
 0x3bc   : > { %v421_v4 = vmul.f32 %v675_v2, %v416_v3 }
 0x3be   : > { %v422_v7 = vsub.f32 1.0, %v421_v4 }
 0x3c0   : > { %v423_v9 = vmul.f32 %v422_v7, %v403_v6 }
 0x3c2   : > { %v424_v10 = vadd.f32 1.0, %v423_v9 }
 0x3c4   : > { %v425_v11 = vmul.f32 %v424_v10, %v400_v8 }
 0x3c6   : > { %v426_v12 = vpack.c.bf16 %v425_v11, %v425_v11 }
 0x3c8   : > { %428 = vst.msk [vmem:[%s210_s13] sm:$0x1] %vm427_vm13, %v426_v12 }
 0x3c9   : > { %759 = shalt.err (!%p756_p12)
}
 0x3ca   : > { %s760_s27 = scalar_lea.hbm %s1075_s4, 16  ;;  %s764_s20 = scalar_lea.hbm %s1128_s3, 64 }
 0x3cb   : > { %p761_p0 = scmp.ne.s32.totalorder %s1075_s4, %s760_s27  ;;  %p765_p1 = scmp.lt.u32.totalorder %s1075_s4, %s1128_s3 }
 0x3cc   : > { %p766_p11 = scmp.lt.u32.totalorder %s764_s20, %s760_s27  ;;  %p768_p6 = scmp.lt.u32.totalorder %s760_s27, %s1075_s4 }
 0x3cd   : > { %p762_p5 = pnand %p761_p0, %p1141_p9 }
 0x3ce   : > { %p767_p2 = por %p766_p11, %p765_p1 }
 0x3cf   : > { %p763_p8 = pneg %p762_p5 }
 0x3d0   : > { %p769_p7 = por %p768_p6, %p767_p2 }
 0x3d2   : > { %p770_p10 = pnand %p769_p7, %p763_p8 }
 0x3d4   : > { %773 = shalt.err (!%p770_p10)
}
 0x3d5   : > { %580 = dma.vmem_to_hbm [thread:$0]  (%p1141_p9), %s1077_s30, 16, %s1075_s4, %s430_s5  }
 0x3d6 PF: > { %p594_p13 = scmp.ge.s32.totalorder %s842_s0, 2  ;;  %s455_s18 = sand.u32 1, %s822_s22  }
 0x3d7   : > { %p1142_p3 = scmp.ne.s32.totalorder %s1134_s9, 0  ;;  %s456_s14 = scalar_lea.sflag [#allocation7], %s455_s18 }
 0x3d9   : > { %p590_p4 = pnand %p594_p13, %p1142_p3 }
 0x3db   : > { %817 = dma.done.wait (!%p590_p4), %s456_s14, 16  }
 0x3dc   : > { %819 = vsyncadd (!%p590_p4), %s456_s14, 4294967280  ;;  %s26_s0 = sadd.s32 1, %s842_s0   ;;  %s1143_s22 = smov %s826_s23 }
 0x3dd   : > { %p23_p12 = scmp.ge.s32.totalorder %s26_s0, 6   ;;  %s1144_s23 = smov %s830_s24 }
 0x3de   : > { %s1145_s24 = smov %s956_s8  ;;  %s1146_s25 = smov %s838_s26 }
 0x3df   : > { %s1147_s26 = smov %s1149_s29  ;;  %25 = sbr.rel (!%p23_p12) target bundleno = 20 (0x14), region = 111 }
 0x3e6   :  { %460 = vsyncpa [#allocation6], 1 }
 0x3e7   :  { %462 = vsyncpa [#allocation6 + $0x1], 1 }
 0x3e8   :  { %463 = vsyncpa [#allocation9], 1 }
 0x3e9   :  { %465 = vsyncpa [#allocation9 + $0x1], 1 }
 0x3ea   :  { %466 = vsyncpa [#allocation7], 1 }
 0x3eb   :  { %468 = vsyncpa [#allocation7 + $0x1], 1 }

</bundles_post_ra>
